<compile_context>
chip_gen: v6e
topology: v6e:2x2x1
jax: 0.10.0
libtpu: 0.0.40
codegen_flags: <defaults>
</compile_context>

<pallas_src>
import functools

import jax
import jax.numpy as jnp
from jax.experimental import pallas as pl
from jax.experimental.pallas import tpu as pltpu

EPS = 1e-3        # BatchNorm2d eps=0.001
COUT_PAD = 128    # lane-dense output channel count
K_PAD = 256       # lane-dense / MXU-depth-aligned contraction size (9*24=216 -> 256)


def _conv_bn_kernel(p_ref, w_ref, g_ref, b_ref, o_ref, *, inv_count, n_pad, eps):
    # p_ref: [rows_pad, 256] bf16  im2col patches (zero rows beyond the 196 valid ones)
    # w_ref: [256, 128]      bf16  flattened conv weights (zero padded)
    # g_ref: [1, 128]        f32   BN gamma (zero padded)
    # b_ref: [1, 128]        f32   BN beta  (zero padded)
    # o_ref: [rows_pad, 128] f32
    #
    # One MXU matmul, f32 accumulation.
    acc = jnp.dot(p_ref[...], w_ref[...], preferred_element_type=jnp.float32)

    # BatchNorm (training mode), two-pass statistics over the valid rows.
    # Padded rows have acc == 0, so:
    #   * the mean needs no mask (they add 0 to the sum, divisor is the true count);
    #   * the centered sum-of-squares picks up exactly n_pad * mean^2 extra per
    #     channel, which is subtracted in closed form instead of a masked pass.
    mean = jnp.sum(acc, axis=0, keepdims=True) * inv_count            # [1, 128]
    d = acc - mean
    ss = jnp.sum(d * d, axis=0, keepdims=True)                        # [1, 128]
    var = (ss - float(n_pad) * mean * mean) * inv_count
    scale = g_ref[...] * jax.lax.rsqrt(var + eps)                     # [1, 128]
    o_ref[...] = d * scale + b_ref[...]


def conv_bn_forward(x_nchw, w_oihw, gamma, beta):
    """x_nchw: [1, Cin, H, W]; w_oihw: [Cout, Cin, 3, 3]; gamma/beta: [Cout]."""
    N, Cin, H, W = x_nchw.shape
    Cout = w_oihw.shape[0]
    assert N == 1, "wrapper specialised to the module's batch size of 1"
    valid = N * H * W                       # 196 real output pixels
    rows_pad = ((valid + 15) // 16) * 16    # 208: bf16-sublane-friendly row count
    K = 9 * Cin                             # 216

    # ---- tiny wrapper-side im2col glue (~100 KB total) ----
    x_hwc = jnp.transpose(x_nchw, (0, 2, 3, 1))[0]                     # [H, W, Cin]
    xp = jnp.pad(x_hwc, ((1, 1), (1, 1), (0, 0)))                      # [H+2, W+2, Cin]
    slabs = [xp[kh:kh + H, kw:kw + W, :] for kh in range(3) for kw in range(3)]
    patches = jnp.stack(slabs, axis=2).reshape(valid, K)               # [196, 216]
    patches = jnp.pad(patches, ((0, rows_pad - valid), (0, K_PAD - K)))
    patches = patches.astype(jnp.bfloat16)                             # [208, 256]

    # [Cout,Cin,3,3] -> (kh,kw,cin,cout) -> [216, 64] -> padded bf16 [256, 128]
    w_mat = jnp.transpose(w_oihw, (2, 3, 1, 0)).reshape(K, Cout)
    w_mat = jnp.pad(w_mat, ((0, K_PAD - K), (0, COUT_PAD - Cout))).astype(jnp.bfloat16)

    gamma_p = jnp.pad(gamma.astype(jnp.float32),
                      (0, COUT_PAD - Cout)).reshape(1, COUT_PAD)
    beta_p = jnp.pad(beta.astype(jnp.float32),
                     (0, COUT_PAD - Cout)).reshape(1, COUT_PAD)

    kernel = functools.partial(_conv_bn_kernel,
                               inv_count=1.0 / float(valid),
                               n_pad=rows_pad - valid,
                               eps=EPS)

    cost = pl.CostEstimate(
        flops=2 * valid * K * Cout,
        transcendentals=0,
        bytes_accessed=(patches.size * 2 + w_mat.size * 2
                        + (gamma_p.size + beta_p.size) * 4
                        + rows_pad * COUT_PAD * 4),
    )

    out_flat = pl.pallas_call(
        kernel,
        out_shape=jax.ShapeDtypeStruct((rows_pad, COUT_PAD), jnp.float32),
        in_specs=[pl.BlockSpec(memory_space=pltpu.MemorySpace.VMEM)] * 4,
        out_specs=pl.BlockSpec(memory_space=pltpu.MemorySpace.VMEM),
        cost_estimate=cost,
    )(patches, w_mat, gamma_p, beta_p)

    # [208, 128] -> drop pad rows / pad channels -> [H, W, Cout] -> NCHW
    out = out_flat[:valid, :Cout].reshape(H, W, Cout)
    return jnp.transpose(out, (2, 0, 1))[None]                         # [1, Cout, H, W]


def _reference(x_nchw, w_oihw, gamma, beta):
    y = jax.lax.conv_general_dilated(
        x_nchw, w_oihw,
        window_strides=(1, 1),
        padding=((1, 1), (1, 1)),
        dimension_numbers=("NCHW", "OIHW", "NCHW"),
    )
    mean = jnp.mean(y, axis=(0, 2, 3), keepdims=True)
    var = jnp.mean((y - mean) ** 2, axis=(0, 2, 3), keepdims=True)
    g = gamma.reshape(1, -1, 1, 1)
    b = beta.reshape(1, -1, 1, 1)
    return (y - mean) * jax.lax.rsqrt(var + EPS) * g + b


if __name__ == "__main__":
    key = jax.random.PRNGKey(0)
    kx, kw_, kg, kb = jax.random.split(key, 4)

    N, Cin, H, W, Cout = 1, 24, 14, 14, 64     # matches the PyTorch module
    x = jax.random.normal(kx, (N, Cin, H, W), dtype=jnp.float32)
    w = jax.random.normal(kw_, (Cout, Cin, 3, 3), dtype=jnp.float32) * 0.1
    gamma = 1.0 + 0.1 * jax.random.normal(kg, (Cout,), dtype=jnp.float32)
    beta = 0.1 * jax.random.normal(kb, (Cout,), dtype=jnp.float32)

    conv_bn = jax.jit(conv_bn_forward)
    out = conv_bn(x, w, gamma, beta)
    out = jax.block_until_ready(out)

    ref = _reference(x, w, gamma, beta)
    assert out.shape == (N, Cout, H, W)
    # bf16 MXU operands (f32 accumulation) vs. an f32 reference: tolerance sized to
    # bf16 input quantisation (~1e-3 relative per element over a 216-term dot).
    err = float(jnp.max(jnp.abs(out - ref)))
    assert jnp.allclose(out, ref, atol=2e-2, rtol=2e-2), err

    print("KERNEL_OK")
</pallas_src>

<mosaic_0001>
module attributes {stable_mosaic.version = 11 : i64} {
  func.func @_conv_bn_kernel(%arg0: memref<208x256xbf16, #tpu.memory_space<vmem>>, %arg1: memref<256x128xbf16, #tpu.memory_space<vmem>>, %arg2: memref<1x128xf32, #tpu.memory_space<vmem>>, %arg3: memref<1x128xf32, #tpu.memory_space<vmem>>, %arg4: memref<208x128xf32, #tpu.memory_space<vmem>>) attributes {dimension_semantics = [], scalar_prefetch = 0 : i64, scratch_operands = 0 : i64, tpu.core_type = #tpu.core_type<tc>} {
    %c0 = arith.constant 0 : index
    %c0_0 = arith.constant 0 : index
    %0 = vector.load %arg0[%c0, %c0_0] : memref<208x256xbf16, #tpu.memory_space<vmem>>, vector<208x256xbf16>
    %c0_1 = arith.constant 0 : index
    %c0_2 = arith.constant 0 : index
    %1 = vector.load %arg1[%c0_1, %c0_2] : memref<256x128xbf16, #tpu.memory_space<vmem>>, vector<256x128xbf16>
    %cst = arith.constant dense<0.000000e+00> : vector<208x128xf32>
    %2 = tpu.matmul %0, %1, %cst {dimension_numbers = #tpu.dot_dimension_numbers<[1], [0], [0], [1], [0, 0, 1, 1], [], []>} : vector<208x256xbf16>, vector<256x128xbf16>, vector<208x128xf32> -> vector<208x128xf32>
    %cst_3 = arith.constant dense<0.000000e+00> : vector<128xf32>
    %3 = vector.multi_reduction <add>, %2, %cst_3 [0] : vector<208x128xf32> to vector<128xf32>
    %4 = vector.shape_cast %3 : vector<128xf32> to vector<1x128xf32>
    %cst_4 = arith.constant 0.00510204071 : f32
    %5 = vector.broadcast %cst_4 : f32 to vector<1x128xf32>
    %6 = arith.mulf %4, %5 : vector<1x128xf32>
    %7 = vector.broadcast %6 : vector<1x128xf32> to vector<208x128xf32>
    %8 = arith.subf %2, %7 : vector<208x128xf32>
    %9 = arith.mulf %8, %8 : vector<208x128xf32>
    %cst_5 = arith.constant dense<0.000000e+00> : vector<128xf32>
    %10 = vector.multi_reduction <add>, %9, %cst_5 [0] : vector<208x128xf32> to vector<128xf32>
    %11 = vector.shape_cast %10 : vector<128xf32> to vector<1x128xf32>
    %cst_6 = arith.constant 1.200000e+01 : f32
    %12 = vector.broadcast %cst_6 : f32 to vector<1x128xf32>
    %13 = arith.mulf %12, %6 : vector<1x128xf32>
    %14 = arith.mulf %13, %6 : vector<1x128xf32>
    %15 = arith.subf %11, %14 : vector<1x128xf32>
    %cst_7 = arith.constant 0.00510204071 : f32
    %16 = vector.broadcast %cst_7 : f32 to vector<1x128xf32>
    %17 = arith.mulf %15, %16 : vector<1x128xf32>
    %c0_8 = arith.constant 0 : index
    %c0_9 = arith.constant 0 : index
    %18 = vector.load %arg2[%c0_8, %c0_9] : memref<1x128xf32, #tpu.memory_space<vmem>>, vector<1x128xf32>
    %cst_10 = arith.constant 1.000000e-03 : f32
    %19 = vector.broadcast %cst_10 : f32 to vector<1x128xf32>
    %20 = arith.addf %17, %19 : vector<1x128xf32>
    %21 = math.rsqrt %20 : vector<1x128xf32>
    %22 = arith.mulf %18, %21 : vector<1x128xf32>
    %23 = vector.broadcast %22 : vector<1x128xf32> to vector<208x128xf32>
    %24 = arith.mulf %8, %23 : vector<208x128xf32>
    %c0_11 = arith.constant 0 : index
    %c0_12 = arith.constant 0 : index
    %25 = vector.load %arg3[%c0_11, %c0_12] : memref<1x128xf32, #tpu.memory_space<vmem>>, vector<1x128xf32>
    %26 = vector.broadcast %25 : vector<1x128xf32> to vector<208x128xf32>
    %27 = arith.addf %24, %26 : vector<208x128xf32>
    %c0_13 = arith.constant 0 : index
    %c0_14 = arith.constant 0 : index
    %28 = vector.load %arg4[%c0_13, %c0_14] : memref<208x128xf32, #tpu.memory_space<vmem>>, vector<208x128xf32>
    tpu.vector_store %arg4[%c0_13, %c0_14], %27 {strides = array<i32>} : memref<208x128xf32, #tpu.memory_space<vmem>>, vector<208x128xf32>,
    return
  }
}

</mosaic_0001>

<bundles_post_ra>
// kernel: conv_bn_forward.1
= control target key start
LH: loop header
LB: loop body
LE: loop exit
PB: predicated region body
PF: predicated region fallthrough
CT: control target
= control target key end

     0   :  { %s1376_s1 = inlined_call_operand.vmem [shape: bf16[256,128], index: 1, kind: input, shape index: {}]   ;;  %s1377_s0 = inlined_call_operand.vmem [shape: bf16[208,256], index: 0, kind: input, shape index: {}]   ;;  %s1378_s2 = inlined_call_operand.vmem [shape: f32[1,128], index: 2, kind: input, shape index: {}]   ;;  %s1379_s3 = inlined_call_operand.vmem [shape: f32[1,128], index: 3, kind: input, shape index: {}]   ;;  %s1380_s4 = inlined_call_operand.vmem [shape: f32[208,128], index: 4, kind: output, shape index: {}]  }
   0x1   :  { %v810_v0 = vld [vmem:[%s1376_s1 + $0x78] sm:$0xff]   ;;  %v812_v2 = vld [vmem:[%s1376_s1 + $0x70] sm:$0xff]   ;;  %v814_v4 = vld [vmem:[%s1376_s1 + $0x68] sm:$0xff]  }
   0x2   :  { %v811_v1 = vld [vmem:[%s1376_s1 + $0x38] sm:$0xff]   ;;  %700 = vmatprep.subr.bf16.mxu0 %v810_v0  ;;  %794 = vmatprep.subr.bf16.mxu1 %v810_v0  ;;  %v813_v3 = vld [vmem:[%s1376_s1 + $0x30] sm:$0xff]   ;;  %v815_v5 = vld [vmem:[%s1376_s1 + $0x28] sm:$0xff]  }
   0x3   :  { %701 = vmatpush3.bf16.msra.mxu0 %v811_v1  ;;  %802 = vmatpush3.bf16.msra.mxu1 %v811_v1  ;;  %v816_v6 = vld [vmem:[%s1376_s1 + $0x60] sm:$0xff]   ;;  %v818_v8 = vld [vmem:[%s1376_s1 + $0x58] sm:$0xff]   ;;  %v820_v10 = vld [vmem:[%s1376_s1 + $0x50] sm:$0xff]  }
   0x4   :  { %702 = vmatprep.subr.bf16.mxu0 %v812_v2  ;;  %795 = vmatprep.subr.bf16.mxu1 %v812_v2  ;;  %v817_v7 = vld [vmem:[%s1376_s1 + $0x20] sm:$0xff]   ;;  %v819_v9 = vld [vmem:[%s1376_s1 + $0x18] sm:$0xff]   ;;  %v821_v12 = vld [vmem:[%s1376_s1 + $0x10] sm:$0xff]  }
   0x5   :  { %v828_v11 = vld [vmem:[%s1377_s0 + $0x4] ss:$8 sps:$4 sm:$0xff]   ;;  %v840_v14 = vld [vmem:[%s1377_s0 + $0x74] ss:$8 sps:$4 sm:$0xff]   ;;  %v826_v18 = vld [vmem:[%s1377_s0] ss:$8 sps:$4 sm:$0xff]  }
   0x6   :  { %334 = vmatprep.mubr.bf16.mxu0 %v828_v11  ;;  %v822_v13 = vld [vmem:[%s1376_s1 + $0x48] sm:$0xff]   ;;  %v824_v16 = vld [vmem:[%s1376_s1 + $0x40] sm:$0xff]   ;;  %390 = vmatprep.mubr.bf16.mxu1 %v840_v14  ;;  %v829_v19 = vld [vmem:[%s1377_s0 + $0x14] ss:$8 sps:$4 sm:$0xff]  }
   0x7   :  { %703 = vmatpush3.bf16.msra.mxu0 %v813_v3  ;;  %803 = vmatpush3.bf16.msra.mxu1 %v813_v3  ;;  %v823_v15 = vld [vmem:[%s1376_s1 + $0x8] sm:$0xff]   ;;  %v825_v17 = vld [vmem:[%s1376_s1] sm:$0xff]   ;;  %v838_v20 = vld [vmem:[%s1377_s0 + $0x70] ss:$8 sps:$4 sm:$0xff]  }
   0x8   :  { %704 = vmatprep.subr.bf16.mxu0 %v814_v4  ;;  %796 = vmatprep.subr.bf16.mxu1 %v814_v4  ;;  %v844_v21 = vld [vmem:[%s1377_s0 + $0x84] ss:$8 sps:$4 sm:$0xff]   ;;  %v831_v22 = vld [vmem:[%s1377_s0 + $0x10] ss:$8 sps:$4 sm:$0xff]   ;;  %v846_v24 = vld [vmem:[%s1377_s0 + $0x80] ss:$8 sps:$4 sm:$0xff]  }
   0x9   :  { %v832_v23 = vld [vmem:[%s1377_s0 + $0x24] ss:$8 sps:$4 sm:$0xff]   ;;  %v850_v25 = vld [vmem:[%s1377_s0 + $0x94] ss:$8 sps:$4 sm:$0xff]   ;;  %v834_v26 = vld [vmem:[%s1377_s0 + $0x20] ss:$8 sps:$4 sm:$0xff]  }
   0xa   :  { %v835_v27 = vld [vmem:[%s1377_s0 + $0x34] ss:$8 sps:$4 sm:$0xff]   ;;  %v852_v28 = vld [vmem:[%s1377_s0 + $0x90] ss:$8 sps:$4 sm:$0xff]   ;;  %v856_v29 = vld [vmem:[%s1377_s0 + $0xa4] ss:$8 sps:$4 sm:$0xff]  }
   0xb   :  { %705 = vmatpush3.bf16.msra.mxu0 %v815_v5  ;;  %804 = vmatpush3.bf16.msra.mxu1 %v815_v5  ;;  %v837_v30 = vld [vmem:[%s1377_s0 + $0x30] ss:$8 sps:$4 sm:$0xff]   ;;  %v841_v31 = vld [vmem:[%s1377_s0 + $0x44] ss:$8 sps:$4 sm:$0xff]   ;;  %v858_v32 = vld [vmem:[%s1377_s0 + $0xa0] ss:$8 sps:$4 sm:$0xff]  }
   0xc   :  { %706 = vmatprep.subr.bf16.mxu0 %v816_v6  ;;  %797 = vmatprep.subr.bf16.mxu1 %v816_v6  ;;  %v859_v33 = vld [vmem:[%s1377_s0 + $0xb4] ss:$8 sps:$4 sm:$0xff]   ;;  %v843_v34 = vld [vmem:[%s1377_s0 + $0x40] ss:$8 sps:$4 sm:$0xff]   ;;  %v861_v36 = vld [vmem:[%s1377_s0 + $0xb0] ss:$8 sps:$4 sm:$0xff]  }
   0xd   :  { %v847_v35 = vld [vmem:[%s1377_s0 + $0x54] ss:$8 sps:$4 sm:$0xff]   ;;  %v862_v37 = vld [vmem:[%s1377_s0 + $0xc4] ss:$8 sps:$4 sm:$0xff]   ;;  %v849_v38 = vld [vmem:[%s1377_s0 + $0x50] ss:$8 sps:$4 sm:$0xff]  }
   0xe   :  { %v853_v39 = vld [vmem:[%s1377_s0 + $0x64] ss:$8 sps:$4 sm:$0xff]   ;;  %v864_v40 = vld [vmem:[%s1377_s0 + $0xc0] ss:$8 sps:$4 sm:$0xff]  }
   0xf   :  { %707 = vmatpush3.bf16.msra.mxu0 %v817_v7  ;;  %805 = vmatpush3.bf16.msra.mxu1 %v817_v7  ;;  %v855_v41 = vld [vmem:[%s1377_s0 + $0x60] ss:$8 sps:$4 sm:$0xff]  }
  0x10   :  { %708 = vmatprep.subr.bf16.mxu0 %v818_v8  ;;  %798 = vmatprep.subr.bf16.mxu1 %v818_v8 }
  0x13   :  { %709 = vmatpush3.bf16.msra.mxu0 %v819_v9  ;;  %806 = vmatpush3.bf16.msra.mxu1 %v819_v9 }
  0x14   :  { %710 = vmatprep.subr.bf16.mxu0 %v820_v10  ;;  %799 = vmatprep.subr.bf16.mxu1 %v820_v10 }
  0x17   :  { %711 = vmatpush3.bf16.msra.mxu0 %v821_v12  ;;  %807 = vmatpush3.bf16.msra.mxu1 %v821_v12 }
  0x18   :  { %712 = vmatprep.subr.bf16.mxu0 %v822_v13  ;;  %800 = vmatprep.subr.bf16.mxu1 %v822_v13 }
  0x1b   :  { %713 = vmatpush3.bf16.msra.mxu0 %v823_v15  ;;  %808 = vmatpush3.bf16.msra.mxu1 %v823_v15 }
  0x1c   :  { %714 = vmatprep.subr.bf16.mxu0 %v824_v16  ;;  %801 = vmatprep.subr.bf16.mxu1 %v824_v16 }
  0x1f   :  { %715 = vmatpush3.bf16.msra.mxu0 %v825_v17  ;;  %809 = vmatpush3.bf16.msra.mxu1 %v825_v17 }
  0x22   :  { %335 = vmatmul.mubr.bf16.vlgmr.msra.gmra.mxu0 %v826_v18  ;;  %391 = vmatmul.mubr.bf16.vlgmr.msra.gmra.mxu1 %v838_v20 }
  0x23   :  { %342 = vmatprep.mubr.bf16.mxu0 %v829_v19  ;;  %398 = vmatprep.mubr.bf16.mxu1 %v844_v21 }
  0x2a   :  { %343 = vmatmul.mubr.bf16.gmra.mxu0 %v831_v22  ;;  %399 = vmatmul.mubr.bf16.gmra.mxu1 %v846_v24 }
  0x2b   :  { %350 = vmatprep.mubr.bf16.mxu0 %v832_v23  ;;  %406 = vmatprep.mubr.bf16.mxu1 %v850_v25 }
  0x32   :  { %351 = vmatmul.mubr.bf16.gmra.mxu0 %v834_v26  ;;  %407 = vmatmul.mubr.bf16.gmra.mxu1 %v852_v28 }
  0x33   :  { %358 = vmatprep.mubr.bf16.mxu0 %v835_v27  ;;  %414 = vmatprep.mubr.bf16.mxu1 %v856_v29 }
  0x3a   :  { %359 = vmatmul.mubr.bf16.gmra.mxu0 %v837_v30  ;;  %415 = vmatmul.mubr.bf16.gmra.mxu1 %v858_v32 }
  0x3b   :  { %366 = vmatprep.mubr.bf16.mxu0 %v841_v31  ;;  %422 = vmatprep.mubr.bf16.mxu1 %v859_v33 }
  0x42   :  { %367 = vmatmul.mubr.bf16.gmra.mxu0 %v843_v34  ;;  %423 = vmatmul.mubr.bf16.gmra.mxu1 %v861_v36 }
  0x43   :  { %374 = vmatprep.mubr.bf16.mxu0 %v847_v35  ;;  %430 = vmatprep.mubr.bf16.mxu1 %v862_v37 }
  0x4a   :  { %375 = vmatmul.mubr.bf16.gmra.mxu0 %v849_v38  ;;  %431 = vmatmul.mubr.bf16.gmra.mxu1 %v864_v40 }
  0x4b   :  { %382 = vmatprep.mubr.bf16.mxu0 %v853_v39 }
  0x52   :  { %383 = vmatmul.mubr.bf16.gmra.mxu0 %v855_v41 }
  0xe2   :  { %v716_v42 = vpop.f32.mrf.mxu0  ;;  %v1018_v43 = vpop.f32.mrf.mxu1 }
  0xe4   :  { %v717_v44 = vpop.f32.mrf.mxu0  ;;  %v1020_v45 = vpop.f32.mrf.mxu1 }
  0xe5   :  { %v1040_v7 = vadd.f32 %v717_v44, %v716_v42 }
  0xe6   :  { %v719_v46 = vpop.f32.mrf.mxu0  ;;  %v1022_v47 = vpop.f32.mrf.mxu1 }
  0xe8   :  { %v720_v48 = vpop.f32.mrf.mxu0  ;;  %v1024_v49 = vpop.f32.mrf.mxu1 }
  0xe9   :  { %v1038_v5 = vadd.f32 %v720_v48, %v719_v46 }
  0xea   :  { %v722_v50 = vpop.f32.mrf.mxu0  ;;  %v1026_v51 = vpop.f32.mrf.mxu1 }
  0xeb   :  { %v439_v11 = vadd.f32 %v1038_v5, %v1040_v7 }
  0xec   :  { %v723_v52 = vpop.f32.mrf.mxu0  ;;  %v1028_v53 = vpop.f32.mrf.mxu1 }
  0xed   :  { %v1042_v8 = vadd.f32 %v723_v52, %v722_v50 }
  0xee   :  { %v725_v54 = vpop.f32.mrf.mxu0  ;;  %v1030_v55 = vpop.f32.mrf.mxu1 }
  0xef   :  { %v440_v14 = vadd.f32 %v1042_v8, %v439_v11 }
  0xf0   :  { %v726_v56 = vpop.f32.mrf.mxu0  ;;  %v1032_v57 = vpop.f32.mrf.mxu1 }
  0xf1   :  { %v1046_v12 = vadd.f32 %v726_v56, %v725_v54 }
  0xf2   :  { %v728_v58 = vpop.f32.mrf.mxu0  ;;  %v1034_v59 = vpop.f32.mrf.mxu1 }
  0xf3   :  { %v441_v18 = vadd.f32 %v1046_v12, %v440_v14 }
  0xf4   :  { %v729_v60 = vpop.f32.mrf.mxu0  ;;  %v1036_v62 = vpop.f32.mrf.mxu1 }
  0xf5   :  { %v1049_v15 = vadd.f32 %v729_v60, %v728_v58  ;;  %v1081_v60 = vadd.f32 %v1020_v45, %v1018_v43 }
  0xf6   :  { %v731_v61 = vpop.f32.mrf.mxu0  ;;  %v773_v1 = vpop.f32.mrf.mxu1 }
  0xf7   :  { %v442_v21 = vadd.f32 %v1049_v15, %v441_v18 }
  0xf8   :  { %v732_v63 = vpop.f32.mrf.mxu0  ;;  %v774_v4 = vpop.f32.mrf.mxu1 }
  0xf9   :  { %v1052_v19 = vadd.f32 %v732_v63, %v731_v61  ;;  %v1086_v63 = vadd.f32 %v1024_v49, %v1022_v47  ;;  %v1101_v47 = vadd.f32 %v1036_v62, %v1034_v59  ;;  %v1104_v11 = vadd.f32 %v774_v4, %v773_v1 }
  0xfa   :  { %v734_v0 = vpop.f32.mrf.mxu0  ;;  %v776_v10 = vpop.f32.mrf.mxu1 }
  0xfb   :  { %v443_v25 = vadd.f32 %v1052_v19, %v442_v21 }
  0xfc   :  { %v735_v2 = vpop.f32.mrf.mxu0  ;;  %v777_v17 = vpop.f32.mrf.mxu1 }
  0xfd   :  { %v1055_v22 = vadd.f32 %v735_v2, %v734_v0 }
  0xfe   :  { %v737_v3 = vpop.f32.mrf.mxu0  ;;  %v779_v24 = vpop.f32.mrf.mxu1 }
  0xff   :  { %v444_v28 = vadd.f32 %v1055_v22, %v443_v25 }
 0x100   :  { %v738_v6 = vpop.f32.mrf.mxu0  ;;  %v780_v31 = vpop.f32.mrf.mxu1 }
 0x101   :  { %v1058_v26 = vadd.f32 %v738_v6, %v737_v3  ;;  %v1091_v3 = vadd.f32 %v1028_v53, %v1026_v51 }
 0x102   :  { %v740_v9 = vpop.f32.mrf.mxu0  ;;  %v782_v38 = vpop.f32.mrf.mxu1 }
 0x103   :  { %v445_v32 = vadd.f32 %v1058_v26, %v444_v28 }
 0x104   :  { %v741_v13 = vpop.f32.mrf.mxu0  ;;  %v783_v48 = vpop.f32.mrf.mxu1 }
 0x105   :  { %v1061_v29 = vadd.f32 %v741_v13, %v740_v9  ;;  %v1096_v9 = vadd.f32 %v1032_v57, %v1030_v55  ;;  %v1107_v13 = vadd.f32 %v777_v17, %v776_v10  ;;  %v1110_v55 = vadd.f32 %v780_v31, %v779_v24 }
 0x106   :  { %v743_v16 = vpop.f32.mrf.mxu0  ;;  %v785_v58 = vpop.f32.mrf.mxu1  ;;  %v1114_v59 = vadd.f32 %v783_v48, %v782_v38 }
 0x107   :  { %v446_v35 = vadd.f32 %v1061_v29, %v445_v32 }
 0x108   :  { %v744_v20 = vpop.f32.mrf.mxu0  ;;  %v786_v2 = vpop.f32.mrf.mxu1 }
 0x109   :  { %v1064_v33 = vadd.f32 %v744_v20, %v743_v16  ;;  %v1117_v1 = vadd.f32 %v786_v2, %v785_v58 }
 0x10a   :  { %v746_v23 = vpop.f32.mrf.mxu0  ;;  %v788_v45 = vpop.f32.mrf.mxu1 }
 0x10b   :  { %v447_v39 = vadd.f32 %v1064_v33, %v446_v35 }
 0x10c   :  { %v747_v27 = vpop.f32.mrf.mxu0  ;;  %v789_v53 = vpop.f32.mrf.mxu1 }
 0x10d   :  { %v1067_v36 = vadd.f32 %v747_v27, %v746_v23  ;;  %v1120_v10 = vadd.f32 %v789_v53, %v788_v45 }
 0x10e   :  { %v749_v30 = vpop.f32.mrf.mxu0  ;;  %v791_v16 = vpop.f32.mrf.mxu1 }
 0x10f   :  { %v448_v42 = vadd.f32 %v1067_v36, %v447_v39 }
 0x110   :  { %v750_v34 = vpop.f32.mrf.mxu0  ;;  %v792_v4 = vpop.f32.mrf.mxu1 }
 0x111   :  { %v1070_v40 = vadd.f32 %v750_v34, %v749_v30  ;;  %v1123_v21 = vadd.f32 %v792_v4, %v791_v16 }
 0x112   :  { %v752_v37 = vpop.f32.mrf.mxu0 }
 0x113   :  { %v449_v50 = vadd.f32 %v1070_v40, %v448_v42 }
 0x114   :  { %v753_v41 = vpop.f32.mrf.mxu0 }
 0x115   :  { %v1073_v44 = vadd.f32 %v753_v41, %v752_v37 }
 0x116   :  { %v755_v46 = vpop.f32.mrf.mxu0 }
 0x117   :  { %v450_v54 = vadd.f32 %v1073_v44, %v449_v50 }
 0x118   :  { %v756_v52 = vpop.f32.mrf.mxu0 }
 0x119   :  { %v1077_v56 = vadd.f32 %v756_v52, %v755_v46 }
 0x11b   :  { %v451_v61 = vadd.f32 %v1077_v56, %v450_v54 }
 0x11d   :  { %v452_v0 = vadd.f32 %v1081_v60, %v451_v61 }
 0x11f   :  { %v453_v6 = vadd.f32 %v1086_v63, %v452_v0 }
 0x121   :  { %v454_v43 = vadd.f32 %v1091_v3, %v453_v6 }
 0x123   :  { %v455_v49 = vadd.f32 %v1096_v9, %v454_v43 }
 0x125   :  { %v456_v51 = vadd.f32 %v1101_v47, %v455_v49 }
 0x127   :  { %v457_v14 = vadd.f32 %v1104_v11, %v456_v51 }
 0x129   :  { %v458_v57 = vadd.f32 %v1107_v13, %v457_v14 }
 0x12b   :  { %v459_v18 = vadd.f32 %v1110_v55, %v458_v57 }
 0x12d   :  { %v460_v62 = vadd.f32 %v1114_v59, %v459_v18 }
 0x12f   :  { %v461_v20 = vadd.f32 %v1117_v1, %v460_v62 }
 0x131   :  { %v462_v17 = vadd.f32 %v1120_v10, %v461_v20 }
 0x133   :  { %v463_v23 = vadd.f32 %v1123_v21, %v462_v17 }
 0x135   :  { %v464_v24 = vrot.slane %v463_v23, 4 }
 0x137   :  { %v465_v25 = vadd.f32 %v464_v24, %v463_v23 }
 0x139   :  { %v466_v27 = vrot.slane %v465_v25, 2 }
 0x13b   :  { %v467_v28 = vadd.f32 %v466_v27, %v465_v25 }
 0x13d   :  { %v468_v30 = vrot.slane %v467_v28, 1 }
 0x13f   :  { %v469_v31 = vadd.f32 %v468_v30, %v467_v28 }
 0x141   :  { %v1126_v32 = vmul.f32 0.0051020407, %v469_v31 }
 0x143   :  { %v1130_v34 = vsub.f32 %v1040_v7, %v1126_v32  ;;  %v1134_v35 = vsub.f32 %v1038_v5, %v1126_v32  ;;  %v1138_v37 = vsub.f32 %v1042_v8, %v1126_v32  ;;  %v1146_v41 = vsub.f32 %v1046_v12, %v1126_v32 }
 0x144   :  { %v1150_v7 = vsub.f32 %v1049_v15, %v1126_v32  ;;  %v1156_v8 = vsub.f32 %v1052_v19, %v1126_v32  ;;  %v1162_v12 = vsub.f32 %v1055_v22, %v1126_v32  ;;  %v1168_v52 = vsub.f32 %v1058_v26, %v1126_v32 }
 0x145   :  { %v497_v38 = vmul.f32 %v1130_v34, %v1130_v34  ;;  %v498_v39 = vmul.f32 %v1134_v35, %v1134_v35  ;;  %v499_v5 = vmul.f32 %v1138_v37, %v1138_v37  ;;  %v500_v46 = vmul.f32 %v1146_v41, %v1146_v41 }
 0x146   :  { %v501_v15 = vmul.f32 %v1150_v7, %v1150_v7  ;;  %v502_v19 = vmul.f32 %v1156_v8, %v1156_v8  ;;  %v1174_v58 = vsub.f32 %v1061_v29, %v1126_v32  ;;  %v503_v22 = vmul.f32 %v1162_v12, %v1162_v12 }
 0x147   :  { %v523_v42 = vadd.f32 %v498_v39, %v497_v38  ;;  %v1180_v0 = vsub.f32 %v1064_v33, %v1126_v32  ;;  %v504_v26 = vmul.f32 %v1168_v52, %v1168_v52  ;;  %v1186_v6 = vsub.f32 %v1067_v36, %v1126_v32 }
 0x148   :  { %v505_v29 = vmul.f32 %v1174_v58, %v1174_v58  ;;  %v1192_v45 = vsub.f32 %v1070_v40, %v1126_v32  ;;  %v1198_v51 = vsub.f32 %v1073_v44, %v1126_v32  ;;  %v1204_v14 = vsub.f32 %v1077_v56, %v1126_v32 }
 0x149   :  { %v524_v48 = vadd.f32 %v523_v42, %v499_v5  ;;  %v506_v33 = vmul.f32 %v1180_v0, %v1180_v0  ;;  %v507_v36 = vmul.f32 %v1186_v6, %v1186_v6  ;;  %v1210_v16 = vsub.f32 %v1081_v60, %v1126_v32 }
 0x14a   :  { %v508_v40 = vmul.f32 %v1192_v45, %v1192_v45  ;;  %v509_v44 = vmul.f32 %v1198_v51, %v1198_v51  ;;  %v1216_v62 = vsub.f32 %v1086_v63, %v1126_v32  ;;  %v510_v56 = vmul.f32 %v1204_v14, %v1204_v14 }
 0x14b   :  { %v525_v50 = vadd.f32 %v524_v48, %v500_v46  ;;  %v1222_v20 = vsub.f32 %v1091_v3, %v1126_v32  ;;  %v511_v60 = vmul.f32 %v1210_v16, %v1210_v16  ;;  %v1228_v23 = vsub.f32 %v1096_v9, %v1126_v32 }
 0x14c   :  { %v512_v63 = vmul.f32 %v1216_v62, %v1216_v62  ;;  %v1234_v25 = vsub.f32 %v1101_v47, %v1126_v32  ;;  %v1240_v28 = vsub.f32 %v1104_v11, %v1126_v32  ;;  %v1246_v31 = vsub.f32 %v1107_v13, %v1126_v32 }
 0x14d   :  { %v526_v54 = vadd.f32 %v525_v50, %v501_v15  ;;  %v513_v3 = vmul.f32 %v1222_v20, %v1222_v20  ;;  %v514_v9 = vmul.f32 %v1228_v23, %v1228_v23  ;;  %v1252_v39 = vsub.f32 %v1110_v55, %v1126_v32 }
 0x14e   :  { %v515_v47 = vmul.f32 %v1234_v25, %v1234_v25  ;;  %v516_v11 = vmul.f32 %v1240_v28, %v1240_v28  ;;  %v493_v42 = vsub.f32 %v1114_v59, %v1126_v32  ;;  %v517_v46 = vmul.f32 %v1246_v31, %v1246_v31 }
 0x14f   :  { %v527_v61 = vadd.f32 %v526_v54, %v502_v19  ;;  %v494_v48 = vsub.f32 %v1117_v1, %v1126_v32  ;;  %v518_v15 = vmul.f32 %v1252_v39, %v1252_v39  ;;  %v495_v55 = vsub.f32 %v1120_v10, %v1126_v32 }
 0x150   :  { %v519_v19 = vmul.f32 %v493_v42, %v493_v42 }
 0x151   :  { %v528_v2 = vadd.f32 %v527_v61, %v503_v22  ;;  %v496_v22 = vsub.f32 %v1123_v21, %v1126_v32  ;;  %v520_v59 = vmul.f32 %v494_v48, %v494_v48 }
 0x153   :  { %v529_v43 = vadd.f32 %v528_v2, %v504_v26  ;;  %v521_v26 = vmul.f32 %v495_v55, %v495_v55 }
 0x155   :  { %v530_v49 = vadd.f32 %v529_v43, %v505_v29  ;;  %v522_v29 = vmul.f32 %v496_v22, %v496_v22 }
 0x157   :  { %v531_v53 = vadd.f32 %v530_v49, %v506_v33 }
 0x159   :  { %v532_v57 = vadd.f32 %v531_v53, %v507_v36 }
 0x15b   :  { %v533_v18 = vadd.f32 %v532_v57, %v508_v40  ;;  %v554_v40 = vmul.f32 12.0, %v1126_v32 }
 0x15d   :  { %v534_v4 = vadd.f32 %v533_v18, %v509_v44  ;;  %v555_v44 = vmul.f32 %v554_v40, %v1126_v32 }
 0x15f   :  { %v535_v17 = vadd.f32 %v534_v4, %v510_v56  ;;  %v563_v4 = vlaneseq }
 0x161   :  { %v536_v24 = vadd.f32 %v535_v17, %v511_v60  ;;  %v564_v60 = vshrl.u32 %v563_v4, 7  ;;  %v558_v17 = vld [vmem:[%s1378_s2] sm:$0x1] }
 0x163   :  { %v537_v27 = vadd.f32 %v536_v24, %v512_v63  ;;  %v565_v63 = vsub.s32 0, %v564_v60 }
 0x165   :  { %v538_v30 = vadd.f32 %v537_v27, %v513_v3 }
 0x167   :  { %v539_v38 = vadd.f32 %v538_v30, %v514_v9 }
 0x169   :  { %v540_v5 = vadd.f32 %v539_v38, %v515_v47 }
 0x16b   :  { %v541_v13 = vadd.f32 %v540_v5, %v516_v11 }
 0x16d   :  { %v542_v50 = vadd.f32 %v541_v13, %v517_v46 }
 0x16f   :  { %v543_v54 = vadd.f32 %v542_v50, %v518_v15 }
 0x171   :  { %v544_v61 = vadd.f32 %v543_v54, %v519_v19 }
 0x173   :  { %v545_v2 = vadd.f32 %v544_v61, %v520_v59 }
 0x175   :  { %v546_v43 = vadd.f32 %v545_v2, %v521_v26 }
 0x177   :  { %v547_v33 = vadd.f32 %v546_v43, %v522_v29 }
 0x179   :  { %v548_v1 = vrot.slane %v547_v33, 4 }
 0x17b   :  { %v549_v49 = vadd.f32 %v548_v1, %v547_v33 }
 0x17d   :  { %v550_v36 = vrot.slane %v549_v49, 2 }
 0x17f   :  { %v551_v53 = vadd.f32 %v550_v36, %v549_v49 }
 0x181   :  { %v552_v57 = vrot.slane %v551_v53, 1 }
 0x183   :  { %v553_v10 = vadd.f32 %v552_v57, %v551_v53 }
 0x185   :  { %v556_v18 = vsub.f32 %v553_v10, %v555_v44 }
 0x187   :  { %v557_v56 = vmul.f32 0.0051020407, %v556_v18 }
 0x189   :  { %v559_v21 = vadd.f32 0.001, %v557_v56 }
 0x18b   :  { %865 = vrsqrt.f32 %v559_v21 }
 0x198   :  { %v866_v24 = vpop.eup %865 }
 0x199   :  { %v561_v3 = vmul.f32 %v866_v24, %v558_v17 }
 0x19b   :  { %v566_v27 = vrot.slane %v561_v3, %v565_v63 }
 0x19d   :  { %v568_v9 = vmul.f32 %v566_v27, %v1130_v34  ;;  %v569_v30 = vmul.f32 %v566_v27, %v1134_v35  ;;  %v570_v32 = vmul.f32 %v566_v27, %v1138_v37  ;;  %v571_v47 = vmul.f32 %v566_v27, %v1146_v41 }
 0x19e   :  { %v572_v38 = vmul.f32 %v566_v27, %v1150_v7  ;;  %v573_v11 = vmul.f32 %v566_v27, %v1156_v8  ;;  %v574_v5 = vmul.f32 %v566_v27, %v1162_v12  ;;  %v575_v46 = vmul.f32 %v566_v27, %v1168_v52  ;;  %v699_v12 = vld [vmem:[%s1379_s3] ss:$0 sm:$0xff] }
 0x19f   :  { %v576_v13 = vmul.f32 %v566_v27, %v1174_v58  ;;  %v577_v15 = vmul.f32 %v566_v27, %v1180_v0  ;;  %v578_v34 = vmul.f32 %v566_v27, %v1186_v6  ;;  %v579_v35 = vmul.f32 %v566_v27, %v1192_v45 }
 0x1a0   :  { %v580_v37 = vmul.f32 %v566_v27, %v1198_v51  ;;  %v581_v41 = vmul.f32 %v566_v27, %v1204_v14  ;;  %v582_v7 = vmul.f32 %v566_v27, %v1210_v16  ;;  %v583_v8 = vmul.f32 %v566_v27, %v1216_v62 }
 0x1a1   :  { %v584_v52 = vmul.f32 %v566_v27, %v1222_v20  ;;  %v585_v58 = vmul.f32 %v566_v27, %v1228_v23  ;;  %v586_v0 = vmul.f32 %v566_v27, %v1234_v25  ;;  %v587_v6 = vmul.f32 %v566_v27, %v1240_v28 }
 0x1a2   :  { %v588_v45 = vmul.f32 %v566_v27, %v1246_v31  ;;  %v589_v51 = vmul.f32 %v566_v27, %v1252_v39  ;;  %v590_v14 = vmul.f32 %v566_v27, %v493_v42  ;;  %v591_v16 = vmul.f32 %v566_v27, %v494_v48 }
 0x1a3   :  { %v592_v50 = vmul.f32 %v566_v27, %v495_v55  ;;  %v593_v62 = vmul.f32 %v566_v27, %v496_v22  ;;  %v601_v19 = vadd.f32 %v699_v12, %v568_v9  ;;  %v602_v54 = vadd.f32 %v699_v12, %v569_v30 }
 0x1a4   :  { %v603_v59 = vadd.f32 %v699_v12, %v570_v32  ;;  %v604_v61 = vadd.f32 %v699_v12, %v571_v47  ;;  %v605_v26 = vadd.f32 %v699_v12, %v572_v38  ;;  %v606_v20 = vadd.f32 %v699_v12, %v573_v11 }
 0x1a5   :  { %v607_v2 = vadd.f32 %v699_v12, %v574_v5  ;;  %v608_v23 = vadd.f32 %v699_v12, %v575_v46  ;;  %v609_v29 = vadd.f32 %v699_v12, %v576_v13  ;;  %v610_v25 = vadd.f32 %v699_v12, %v577_v15  ;;  %627 = vst [vmem:[%s1380_s4] sm:$0xff] %v601_v19 }
 0x1a6   :  { %628 = vst [vmem:[%s1380_s4 + $0x8] sm:$0xff] %v602_v54  ;;  %v611_v28 = vadd.f32 %v699_v12, %v578_v34  ;;  %v612_v31 = vadd.f32 %v699_v12, %v579_v35  ;;  %v613_v39 = vadd.f32 %v699_v12, %v580_v37  ;;  %v614_v42 = vadd.f32 %v699_v12, %v581_v41 }
 0x1a7   :  { %629 = vst [vmem:[%s1380_s4 + $0x10] sm:$0xff] %v603_v59  ;;  %630 = vst [vmem:[%s1380_s4 + $0x18] sm:$0xff] %v604_v61  ;;  %v615_v48 = vadd.f32 %v699_v12, %v582_v7  ;;  %v616_v55 = vadd.f32 %v699_v12, %v583_v8  ;;  %v617_v22 = vadd.f32 %v699_v12, %v584_v52 }
 0x1a8   :  { %631 = vst [vmem:[%s1380_s4 + $0x20] sm:$0xff] %v605_v26  ;;  %632 = vst [vmem:[%s1380_s4 + $0x28] sm:$0xff] %v606_v20  ;;  %v618_v43 = vadd.f32 %v699_v12, %v585_v58  ;;  %v619_v33 = vadd.f32 %v699_v12, %v586_v0  ;;  %v620_v1 = vadd.f32 %v699_v12, %v587_v6 }
 0x1a9   :  { %633 = vst [vmem:[%s1380_s4 + $0x30] sm:$0xff] %v607_v2  ;;  %634 = vst [vmem:[%s1380_s4 + $0x38] sm:$0xff] %v608_v23  ;;  %v621_v49 = vadd.f32 %v699_v12, %v588_v45  ;;  %v622_v36 = vadd.f32 %v699_v12, %v589_v51  ;;  %v623_v53 = vadd.f32 %v699_v12, %v590_v14 }
 0x1aa   :  { %635 = vst [vmem:[%s1380_s4 + $0x40] sm:$0xff] %v609_v29  ;;  %636 = vst [vmem:[%s1380_s4 + $0x48] sm:$0xff] %v610_v25  ;;  %v624_v40 = vadd.f32 %v699_v12, %v591_v16  ;;  %v625_v57 = vadd.f32 %v699_v12, %v592_v50  ;;  %v626_v10 = vadd.f32 %v699_v12, %v593_v62 }
 0x1ab   :  { %637 = vst [vmem:[%s1380_s4 + $0x50] sm:$0xff] %v611_v28  ;;  %638 = vst [vmem:[%s1380_s4 + $0x58] sm:$0xff] %v612_v31 }
 0x1ac   :  { %639 = vst [vmem:[%s1380_s4 + $0x60] sm:$0xff] %v613_v39  ;;  %640 = vst [vmem:[%s1380_s4 + $0x68] sm:$0xff] %v614_v42 }
 0x1ad   :  { %641 = vst [vmem:[%s1380_s4 + $0x70] sm:$0xff] %v615_v48  ;;  %642 = vst [vmem:[%s1380_s4 + $0x78] sm:$0xff] %v616_v55 }
 0x1ae   :  { %643 = vst [vmem:[%s1380_s4 + $0x80] sm:$0xff] %v617_v22  ;;  %644 = vst [vmem:[%s1380_s4 + $0x88] sm:$0xff] %v618_v43 }
 0x1af   :  { %645 = vst [vmem:[%s1380_s4 + $0x90] sm:$0xff] %v619_v33  ;;  %646 = vst [vmem:[%s1380_s4 + $0x98] sm:$0xff] %v620_v1 }
 0x1b0   :  { %647 = vst [vmem:[%s1380_s4 + $0xa0] sm:$0xff] %v621_v49  ;;  %648 = vst [vmem:[%s1380_s4 + $0xa8] sm:$0xff] %v622_v36 }
 0x1b1   :  { %649 = vst [vmem:[%s1380_s4 + $0xb0] sm:$0xff] %v623_v53  ;;  %650 = vst [vmem:[%s1380_s4 + $0xb8] sm:$0xff] %v624_v40 }
 0x1b2   :  { %651 = vst [vmem:[%s1380_s4 + $0xc0] sm:$0xff] %v625_v57  ;;  %652 = vst [vmem:[%s1380_s4 + $0xc8] sm:$0xff] %v626_v10 }

</bundles_post_ra>
